<compile_context>
chip_gen: v7x
topology: tpu7x:2x2x1
jax: 0.10.0
libtpu: 0.0.40
codegen_flags: <defaults>
</compile_context>

<pallas_src>
import jax
import jax.numpy as jnp
from jax.experimental import pallas as pl
from jax.experimental.pallas import tpu as pltpu  # noqa: F401  (TPU backend)


_LANE = 128  # lane width: pad last dims to a multiple of this for dense stores


# ---------------------------------------------------------------------------
# Fused kernel: 4 GNN layers (no activation) + sigmoid(z_hat @ z_hat^T)
# ---------------------------------------------------------------------------
def _igae_decoder_kernel(z_ref, w5_ref, w6_ref, w7_ref, w8_ref, adj_ref,
                         zhat_ref, gram_ref):
    adj = adj_ref[...]
    z = z_ref[...]
    # GNNLayer(active=False): support = x @ W^T ; out = adj @ support.
    # Weights arrive pre-transposed as (in, out), so no in-kernel transpose.
    for w_ref in (w5_ref, w6_ref, w7_ref, w8_ref):
        support = jnp.dot(z, w_ref[...], preferred_element_type=jnp.float32)
        z = jnp.dot(adj, support, preferred_element_type=jnp.float32)
    zhat_ref[...] = z.astype(zhat_ref.dtype)

    # z_hat_adj = sigmoid(z_hat @ z_hat^T): contract the last axes directly
    # (dot_general) instead of materializing z.T through the XLU.
    gram = jax.lax.dot_general(z, z, (((1,), (1,)), ((), ())),
                               preferred_element_type=jnp.float32)
    gram_ref[...] = jax.nn.sigmoid(gram).astype(gram_ref.dtype)


# ---------------------------------------------------------------------------
# Wrapper
# ---------------------------------------------------------------------------
def _round_up(x, m):
    return ((x + m - 1) // m) * m


def _pad2d(x, rows, cols):
    r, c = x.shape
    return jnp.pad(x, ((0, rows - r), (0, cols - c)))


def _full_spec(shape):
    # Full-array block (no tiling); index_map takes no args since grid=().
    return pl.BlockSpec(shape, lambda: (0,) * len(shape))


@jax.jit
def igae_decoder_forward(params, z_igae, adj):
    """Returns (z_hat, sigmoid(z_hat @ z_hat^T)) matching IGAE_decoder.forward."""
    N, f_in = z_igae.shape
    wts = [params["w5"], params["w6"], params["w7"], params["w8"]]
    n_input = wts[-1].shape[0]

    # Pad N and every feature dim up to a lane multiple so all matmuls and,
    # critically, all output stores are lane-dense; zero padding keeps the
    # math exact in the top-left (valid) block.
    n_pad = _round_up(N, _LANE)
    dims = [f_in] + [w.shape[0] for w in wts]          # [in, d2, d3, d4, n_input]
    dims_pad = [_round_up(d, _LANE) for d in dims]

    z_p = _pad2d(z_igae, n_pad, dims_pad[0])
    adj_p = _pad2d(adj, n_pad, n_pad)
    # Pre-transpose weights to (in, out) and pad.
    wts_p = [_pad2d(w.T, dims_pad[i], dims_pad[i + 1]) for i, w in enumerate(wts)]

    out_shapes = (
        jax.ShapeDtypeStruct((n_pad, dims_pad[-1]), jnp.float32),  # z_hat (padded)
        jax.ShapeDtypeStruct((n_pad, n_pad), jnp.float32),         # gram  (padded)
    )
    in_specs = ([_full_spec(z_p.shape)]
                + [_full_spec(w.shape) for w in wts_p]
                + [_full_spec(adj_p.shape)])
    out_specs = (_full_spec((n_pad, dims_pad[-1])), _full_spec((n_pad, n_pad)))

    z_hat_p, gram_p = pl.pallas_call(
        _igae_decoder_kernel,
        out_shape=out_shapes,
        in_specs=in_specs,
        out_specs=out_specs,
    )(z_p, *wts_p, adj_p)

    # Slice back to true shapes in plain JAX.
    return z_hat_p[:N, :n_input], gram_p[:N, :N]


# ---------------------------------------------------------------------------
# Parameter init (matches torch.nn.init.xavier_uniform_ on (out, in) weights)
# ---------------------------------------------------------------------------
def xavier_uniform(key, out_features, in_features):
    limit = jnp.sqrt(6.0 / (in_features + out_features))
    return jax.random.uniform(key, (out_features, in_features),
                              dtype=jnp.float32, minval=-limit, maxval=limit)


def init_igae_decoder_params(key, gae_n_dec_1, gae_n_dec_2, gae_n_dec_3,
                             gae_n_dec_4, n_input):
    k5, k6, k7, k8 = jax.random.split(key, 4)
    return {
        "w5": xavier_uniform(k5, gae_n_dec_2, gae_n_dec_1),
        "w6": xavier_uniform(k6, gae_n_dec_3, gae_n_dec_2),
        "w7": xavier_uniform(k7, gae_n_dec_4, gae_n_dec_3),
        "w8": xavier_uniform(k8, n_input, gae_n_dec_4),
    }


# ---------------------------------------------------------------------------
# Main
# ---------------------------------------------------------------------------
if __name__ == "__main__":
    # Small, module-consistent sizes.
    N = 16                 # number of nodes
    gae_n_dec_1 = 32       # input feature dim of z_igae
    gae_n_dec_2 = 32
    gae_n_dec_3 = 64
    gae_n_dec_4 = 64
    n_input = 32           # reconstructed feature dim

    key = jax.random.PRNGKey(0)
    k_params, k_z, k_adj = jax.random.split(key, 3)

    params = init_igae_decoder_params(
        k_params, gae_n_dec_1, gae_n_dec_2, gae_n_dec_3, gae_n_dec_4, n_input)

    z_igae = jax.random.normal(k_z, (N, gae_n_dec_1), dtype=jnp.float32)

    # Row-normalized dense adjacency (stand-in for the sparse adj in spmm).
    a = jax.random.uniform(k_adj, (N, N), dtype=jnp.float32)
    a = a + jnp.eye(N, dtype=jnp.float32)
    adj = a / jnp.sum(a, axis=1, keepdims=True)

    z_hat, z_hat_adj = igae_decoder_forward(params, z_igae, adj)
    jax.block_until_ready((z_hat, z_hat_adj))

    # Correctness check against plain-JAX reference.
    def ref_forward(params, z, adj):
        for w in ("w5", "w6", "w7", "w8"):
            z = adj @ (z @ params[w].T)
        return z, jax.nn.sigmoid(z @ z.T)

    z_ref, adj_ref = ref_forward(params, z_igae, adj)
    assert z_hat.shape == (N, n_input)
    assert z_hat_adj.shape == (N, N)
    assert jnp.allclose(z_hat, z_ref, atol=1e-4, rtol=1e-4)
    assert jnp.allclose(z_hat_adj, adj_ref, atol=1e-4, rtol=1e-4)

    print("KERNEL_OK")
</pallas_src>

<mosaic_0001>
module attributes {stable_mosaic.version = 11 : i64} {
  func.func @_igae_decoder_kernel(%arg0: memref<128x128xf32, #tpu.memory_space<vmem>>, %arg1: memref<128x128xf32, #tpu.memory_space<vmem>>, %arg2: memref<128x128xf32, #tpu.memory_space<vmem>>, %arg3: memref<128x128xf32, #tpu.memory_space<vmem>>, %arg4: memref<128x128xf32, #tpu.memory_space<vmem>>, %arg5: memref<128x128xf32, #tpu.memory_space<vmem>>, %arg6: memref<128x128xf32, #tpu.memory_space<vmem>>, %arg7: memref<128x128xf32, #tpu.memory_space<vmem>>) attributes {dimension_semantics = [], scalar_prefetch = 0 : i64, scratch_operands = 0 : i64, tpu.core_type = #tpu.core_type<tc>} {
    %c0 = arith.constant 0 : index
    %c0_0 = arith.constant 0 : index
    %0 = vector.load %arg5[%c0, %c0_0] : memref<128x128xf32, #tpu.memory_space<vmem>>, vector<128x128xf32>
    %c0_1 = arith.constant 0 : index
    %c0_2 = arith.constant 0 : index
    %1 = vector.load %arg0[%c0_1, %c0_2] : memref<128x128xf32, #tpu.memory_space<vmem>>, vector<128x128xf32>
    %c0_3 = arith.constant 0 : index
    %c0_4 = arith.constant 0 : index
    %2 = vector.load %arg1[%c0_3, %c0_4] : memref<128x128xf32, #tpu.memory_space<vmem>>, vector<128x128xf32>
    %cst = arith.constant dense<0.000000e+00> : vector<128x128xf32>
    %3 = tpu.matmul %1, %2, %cst {dimension_numbers = #tpu.dot_dimension_numbers<[1], [0], [0], [1], [0, 0, 1, 1], [], []>} : vector<128x128xf32>, vector<128x128xf32>, vector<128x128xf32> -> vector<128x128xf32>
    %cst_5 = arith.constant dense<0.000000e+00> : vector<128x128xf32>
    %4 = tpu.matmul %0, %3, %cst_5 {dimension_numbers = #tpu.dot_dimension_numbers<[1], [0], [0], [1], [0, 0, 1, 1], [], []>} : vector<128x128xf32>, vector<128x128xf32>, vector<128x128xf32> -> vector<128x128xf32>
    %c0_6 = arith.constant 0 : index
    %c0_7 = arith.constant 0 : index
    %5 = vector.load %arg2[%c0_6, %c0_7] : memref<128x128xf32, #tpu.memory_space<vmem>>, vector<128x128xf32>
    %cst_8 = arith.constant dense<0.000000e+00> : vector<128x128xf32>
    %6 = tpu.matmul %4, %5, %cst_8 {dimension_numbers = #tpu.dot_dimension_numbers<[1], [0], [0], [1], [0, 0, 1, 1], [], []>} : vector<128x128xf32>, vector<128x128xf32>, vector<128x128xf32> -> vector<128x128xf32>
    %cst_9 = arith.constant dense<0.000000e+00> : vector<128x128xf32>
    %7 = tpu.matmul %0, %6, %cst_9 {dimension_numbers = #tpu.dot_dimension_numbers<[1], [0], [0], [1], [0, 0, 1, 1], [], []>} : vector<128x128xf32>, vector<128x128xf32>, vector<128x128xf32> -> vector<128x128xf32>
    %c0_10 = arith.constant 0 : index
    %c0_11 = arith.constant 0 : index
    %8 = vector.load %arg3[%c0_10, %c0_11] : memref<128x128xf32, #tpu.memory_space<vmem>>, vector<128x128xf32>
    %cst_12 = arith.constant dense<0.000000e+00> : vector<128x128xf32>
    %9 = tpu.matmul %7, %8, %cst_12 {dimension_numbers = #tpu.dot_dimension_numbers<[1], [0], [0], [1], [0, 0, 1, 1], [], []>} : vector<128x128xf32>, vector<128x128xf32>, vector<128x128xf32> -> vector<128x128xf32>
    %cst_13 = arith.constant dense<0.000000e+00> : vector<128x128xf32>
    %10 = tpu.matmul %0, %9, %cst_13 {dimension_numbers = #tpu.dot_dimension_numbers<[1], [0], [0], [1], [0, 0, 1, 1], [], []>} : vector<128x128xf32>, vector<128x128xf32>, vector<128x128xf32> -> vector<128x128xf32>
    %c0_14 = arith.constant 0 : index
    %c0_15 = arith.constant 0 : index
    %11 = vector.load %arg4[%c0_14, %c0_15] : memref<128x128xf32, #tpu.memory_space<vmem>>, vector<128x128xf32>
    %cst_16 = arith.constant dense<0.000000e+00> : vector<128x128xf32>
    %12 = tpu.matmul %10, %11, %cst_16 {dimension_numbers = #tpu.dot_dimension_numbers<[1], [0], [0], [1], [0, 0, 1, 1], [], []>} : vector<128x128xf32>, vector<128x128xf32>, vector<128x128xf32> -> vector<128x128xf32>
    %cst_17 = arith.constant dense<0.000000e+00> : vector<128x128xf32>
    %13 = tpu.matmul %0, %12, %cst_17 {dimension_numbers = #tpu.dot_dimension_numbers<[1], [0], [0], [1], [0, 0, 1, 1], [], []>} : vector<128x128xf32>, vector<128x128xf32>, vector<128x128xf32> -> vector<128x128xf32>
    %c0_18 = arith.constant 0 : index
    %c0_19 = arith.constant 0 : index
    %14 = vector.load %arg6[%c0_18, %c0_19] : memref<128x128xf32, #tpu.memory_space<vmem>>, vector<128x128xf32>
    tpu.vector_store %arg6[%c0_18, %c0_19], %13 {strides = array<i32>} : memref<128x128xf32, #tpu.memory_space<vmem>>, vector<128x128xf32>,
    %cst_20 = arith.constant dense<0.000000e+00> : vector<128x128xf32>
    %15 = tpu.matmul %13, %13, %cst_20 {dimension_numbers = #tpu.dot_dimension_numbers<[1], [1], [0], [0], [0, 0, 1, 0], [], []>} : vector<128x128xf32>, vector<128x128xf32>, vector<128x128xf32> -> vector<128x128xf32>
    %16 = arith.negf %15 : vector<128x128xf32>
    %17 = math.exp %16 : vector<128x128xf32>
    %cst_21 = arith.constant 1.000000e+00 : f32
    %18 = vector.broadcast %cst_21 : f32 to vector<128x128xf32>
    %19 = arith.addf %18, %17 : vector<128x128xf32>
    %20 = arith.divf %18, %19 : vector<128x128xf32>
    %c0_22 = arith.constant 0 : index
    %c0_23 = arith.constant 0 : index
    %21 = vector.load %arg7[%c0_22, %c0_23] : memref<128x128xf32, #tpu.memory_space<vmem>>, vector<128x128xf32>
    tpu.vector_store %arg7[%c0_22, %c0_23], %20 {strides = array<i32>} : memref<128x128xf32, #tpu.memory_space<vmem>>, vector<128x128xf32>,
    return
  }
}

</mosaic_0001>

<bundles_post_ra>
// kernel: igae_decoder_forward.1
= control target key start
LH: loop header
LB: loop body
LE: loop exit
PB: predicated region body
PF: predicated region fallthrough
CT: control target
= control target key end

     0   :  { %s3242_s1 = inlined_call_operand.vmem [shape: f32[128,128], index: 1, kind: input, shape index: {}]   ;;  %s3243_s0 = inlined_call_operand.vmem [shape: f32[128,128], index: 0, kind: input, shape index: {}]   ;;  %s3244_s5 = inlined_call_operand.vmem [shape: f32[128,128], index: 5, kind: input, shape index: {}]   ;;  %s3245_s2 = inlined_call_operand.vmem [shape: f32[128,128], index: 2, kind: input, shape index: {}]   ;;  %s3246_s3 = inlined_call_operand.vmem [shape: f32[128,128], index: 3, kind: input, shape index: {}]   ;;  %s3247_s4 = inlined_call_operand.vmem [shape: f32[128,128], index: 4, kind: input, shape index: {}]   ;;  %s3248_s6 = inlined_call_operand.vmem [shape: f32[128,128], index: 6, kind: output, shape index: {0}]   ;;  %s3249_s7 = inlined_call_operand.vmem [shape: f32[128,128], index: 7, kind: output, shape index: {1}]  }
   0x1   :  { %v57_v0 = vld [vmem:[%s3242_s1] sm:$0xff]  ;;  %v58_v1 = vld [vmem:[%s3242_s1 + $0x8] sm:$0xff]  ;;  %v59_v2 = vld [vmem:[%s3242_s1 + $0x10] sm:$0xff] }
   0x2   :  { %v2370_v3 = vpack.c.bf16 %v58_v1, %v57_v0  ;;  %v60_v4 = vld [vmem:[%s3242_s1 + $0x18] sm:$0xff]  ;;  %v61_v6 = vld [vmem:[%s3242_s1 + $0x20] sm:$0xff]  ;;  %v62_v7 = vld [vmem:[%s3242_s1 + $0x28] sm:$0xff] }
   0x3   :  { %v2374_v5 = vpack.c.bf16 %v60_v4, %v59_v2  ;;  %v2378_v8 = vpack.c.bf16 %v62_v7, %v61_v6  ;;  %v41_v9 = vld [vmem:[%s3243_s0] sm:$0xff]  ;;  %v63_v10 = vld [vmem:[%s3242_s1 + $0x30] sm:$0xff]  ;;  %v64_v11 = vld [vmem:[%s3242_s1 + $0x38] sm:$0xff] }
   0x4   :  { %2371 = vmatprep.subr.bf16.mxu1 %v2370_v3  ;;  %1898 = vmatprep.mubr.f32.mxu1 %v41_v9  ;;  %v2382_v12 = vpack.c.bf16 %v64_v11, %v63_v10  ;;  %v65_v13 = vld [vmem:[%s3242_s1 + $0x40] sm:$0xff]  ;;  %v66_v14 = vld [vmem:[%s3242_s1 + $0x48] sm:$0xff]  ;;  %v67_v16 = vld [vmem:[%s3242_s1 + $0x50] sm:$0xff] }
   0x5   :  { %2373 = vmatpush3.bf16.msra.mxu1 %v2370_v3  ;;  %v2386_v15 = vpack.c.bf16 %v66_v14, %v65_v13  ;;  %v68_v17 = vld [vmem:[%s3242_s1 + $0x58] sm:$0xff]  ;;  %v69_v19 = vld [vmem:[%s3242_s1 + $0x60] sm:$0xff]  ;;  %v70_v20 = vld [vmem:[%s3242_s1 + $0x68] sm:$0xff] }
   0x6   :  { %2375 = vmatprep.subr.bf16.mxu1 %v2374_v5  ;;  %v2390_v18 = vpack.c.bf16 %v68_v17, %v67_v16  ;;  %v2394_v21 = vpack.c.bf16 %v70_v20, %v69_v19  ;;  %v71_v22 = vld [vmem:[%s3242_s1 + $0x70] sm:$0xff]  ;;  %v72_v23 = vld [vmem:[%s3242_s1 + $0x78] sm:$0xff]  ;;  %v42_v25 = vld [vmem:[%s3243_s0 + $0x8] sm:$0xff] }
   0x7   :  { %v2398_v24 = vpack.c.bf16 %v72_v23, %v71_v22  ;;  %v43_v26 = vld [vmem:[%s3243_s0 + $0x10] sm:$0xff]  ;;  %v44_v27 = vld [vmem:[%s3243_s0 + $0x18] sm:$0xff]  ;;  %v45_v28 = vld [vmem:[%s3243_s0 + $0x20] sm:$0xff] }
   0x8   :  { %v46_v29 = vld [vmem:[%s3243_s0 + $0x28] sm:$0xff]  ;;  %v47_v30 = vld [vmem:[%s3243_s0 + $0x30] sm:$0xff]  ;;  %v48_v31 = vld [vmem:[%s3243_s0 + $0x38] sm:$0xff] }
   0x9   :  { %2377 = vmatpush3.bf16.msra.mxu1 %v2374_v5  ;;  %v49_v32 = vld [vmem:[%s3243_s0 + $0x40] sm:$0xff]  ;;  %v50_v33 = vld [vmem:[%s3243_s0 + $0x48] sm:$0xff]  ;;  %v51_v34 = vld [vmem:[%s3243_s0 + $0x50] sm:$0xff] }
   0xa   :  { %2379 = vmatprep.subr.bf16.mxu1 %v2378_v8  ;;  %v52_v35 = vld [vmem:[%s3243_s0 + $0x58] sm:$0xff]  ;;  %v53_v36 = vld [vmem:[%s3243_s0 + $0x60] sm:$0xff]  ;;  %v54_v37 = vld [vmem:[%s3243_s0 + $0x68] sm:$0xff] }
   0xb   :  { %v55_v38 = vld [vmem:[%s3243_s0 + $0x70] sm:$0xff]  ;;  %v56_v39 = vld [vmem:[%s3243_s0 + $0x78] sm:$0xff]  ;;  %v2861_v40 = vld [vmem:[%s3244_s5] sm:$0xff] }
   0xc   :  { %v363_v41 = vld [vmem:[%s3245_s2] sm:$0xff]  ;;  %v364_v42 = vld [vmem:[%s3245_s2 + $0x8] sm:$0xff]  ;;  %v365_v43 = vld [vmem:[%s3245_s2 + $0x10] sm:$0xff] }
   0xd   :  { %2381 = vmatpush3.bf16.msra.mxu1 %v2378_v8  ;;  %v2434_v44 = vpack.c.bf16 %v364_v42, %v363_v41  ;;  %v366_v45 = vld [vmem:[%s3245_s2 + $0x18] sm:$0xff]  ;;  %v367_v47 = vld [vmem:[%s3245_s2 + $0x20] sm:$0xff]  ;;  %v368_v48 = vld [vmem:[%s3245_s2 + $0x28] sm:$0xff] }
   0xe   :  { %2383 = vmatprep.subr.bf16.mxu1 %v2382_v12  ;;  %v2438_v46 = vpack.c.bf16 %v366_v45, %v365_v43  ;;  %v2442_v49 = vpack.c.bf16 %v368_v48, %v367_v47  ;;  %v369_v50 = vld [vmem:[%s3245_s2 + $0x30] sm:$0xff]  ;;  %v370_v51 = vld [vmem:[%s3245_s2 + $0x38] sm:$0xff]  ;;  %v371_v53 = vld [vmem:[%s3245_s2 + $0x40] sm:$0xff] }
   0xf   :  { %2435 = vmatprep.subr.bf16.mxu0 %v2434_v44  ;;  %v2446_v52 = vpack.c.bf16 %v370_v51, %v369_v50  ;;  %v372_v54 = vld [vmem:[%s3245_s2 + $0x48] sm:$0xff]  ;;  %v373_v56 = vld [vmem:[%s3245_s2 + $0x50] sm:$0xff]  ;;  %v374_v57 = vld [vmem:[%s3245_s2 + $0x58] sm:$0xff] }
  0x10   :  { %2437 = vmatpush3.bf16.msra.mxu0 %v2434_v44  ;;  %v2450_v55 = vpack.c.bf16 %v372_v54, %v371_v53  ;;  %v2454_v58 = vpack.c.bf16 %v374_v57, %v373_v56  ;;  %v375_v59 = vld [vmem:[%s3245_s2 + $0x60] sm:$0xff]  ;;  %v376_v60 = vld [vmem:[%s3245_s2 + $0x68] sm:$0xff]  ;;  %v377_v62 = vld [vmem:[%s3245_s2 + $0x70] sm:$0xff] }
  0x11   :  { %2385 = vmatpush3.bf16.msra.mxu1 %v2382_v12  ;;  %2439 = vmatprep.subr.bf16.mxu0 %v2438_v46  ;;  %v2458_v61 = vpack.c.bf16 %v376_v60, %v375_v59  ;;  %v378_v63 = vld [vmem:[%s3245_s2 + $0x78] sm:$0xff]  ;;  %v669_v57 = vld [vmem:[%s3246_s3] sm:$0xff]  ;;  %v671_v59 = vld [vmem:[%s3246_s3 + $0x10] sm:$0xff] }
  0x12   :  { %2387 = vmatprep.subr.bf16.mxu1 %v2386_v15  ;;  %v2462_v0 = vpack.c.bf16 %v378_v63, %v377_v62  ;;  %v673_v63 = vld [vmem:[%s3246_s3 + $0x20] sm:$0xff] }
  0x14   :  { %2441 = vmatpush3.bf16.msra.mxu0 %v2438_v46 }
  0x15   :  { %2389 = vmatpush3.bf16.msra.mxu1 %v2386_v15  ;;  %2443 = vmatprep.subr.bf16.mxu0 %v2442_v49 }
  0x16   :  { %2391 = vmatprep.subr.bf16.mxu1 %v2390_v18 }
  0x18   :  { %2445 = vmatpush3.bf16.msra.mxu0 %v2442_v49 }
  0x19   :  { %2393 = vmatpush3.bf16.msra.mxu1 %v2390_v18  ;;  %2447 = vmatprep.subr.bf16.mxu0 %v2446_v52 }
  0x1a   :  { %2395 = vmatprep.subr.bf16.mxu1 %v2394_v21 }
  0x1c   :  { %2449 = vmatpush3.bf16.msra.mxu0 %v2446_v52 }
  0x1d   :  { %2397 = vmatpush3.bf16.msra.mxu1 %v2394_v21  ;;  %2451 = vmatprep.subr.bf16.mxu0 %v2450_v55 }
  0x1e   :  { %2399 = vmatprep.subr.bf16.mxu1 %v2398_v24 }
  0x20   :  { %2453 = vmatpush3.bf16.msra.mxu0 %v2450_v55 }
  0x21   :  { %2401 = vmatpush3.bf16.msra.mxu1 %v2398_v24  ;;  %2455 = vmatprep.subr.bf16.mxu0 %v2454_v58 }
  0x24   :  { %1899 = vmatmul.mubr.f32.vlgmr.msra.gmra.mrb[0].mxu1 %v42_v25  ;;  %2457 = vmatpush3.bf16.msra.mxu0 %v2454_v58  ;;  %v2915_v25 = vld [vmem:[%s3244_s5 + $0x8] sm:$0xff] }
  0x25   :  { %1901 = vmatprep.mubr.f32.mxu1 %v43_v26  ;;  %2459 = vmatprep.subr.bf16.mxu0 %v2458_v61  ;;  %v2920_v26 = vld [vmem:[%s3244_s5 + $0x10] sm:$0xff]  ;;  %v670_v58 = vld [vmem:[%s3246_s3 + $0x8] sm:$0xff] }
  0x26   :  { %v2498_v60 = vpack.c.bf16 %v670_v58, %v669_v57 }
  0x28   :  { %1902 = vmatmul.mubr.f32.gmra.mrb[2].mxu1 %v44_v27  ;;  %2461 = vmatpush3.bf16.msra.mxu0 %v2458_v61  ;;  %v2927_v27 = vld [vmem:[%s3244_s5 + $0x18] sm:$0xff] }
  0x29   :  { %1904 = vmatprep.mubr.f32.mxu1 %v45_v28  ;;  %2463 = vmatprep.subr.bf16.mxu0 %v2462_v0  ;;  %v2932_v28 = vld [vmem:[%s3244_s5 + $0x20] sm:$0xff]  ;;  %v672_v61 = vld [vmem:[%s3246_s3 + $0x18] sm:$0xff] }
  0x2a   :  { %v2502_v62 = vpack.c.bf16 %v672_v61, %v671_v59 }
  0x2c   :  { %1905 = vmatmul.mubr.f32.gmra.mrb[4].mxu1 %v46_v29  ;;  %2465 = vmatpush3.bf16.msra.mxu0 %v2462_v0  ;;  %v2939_v29 = vld [vmem:[%s3244_s5 + $0x28] sm:$0xff] }
  0x2d   :  { %1907 = vmatprep.mubr.f32.mxu1 %v47_v30  ;;  %v2944_v30 = vld [vmem:[%s3244_s5 + $0x30] sm:$0xff]  ;;  %v674_v0 = vld [vmem:[%s3246_s3 + $0x28] sm:$0xff]  ;;  %2499 = vmatprep.subr.bf16.mxu0 %v2498_v60 }
  0x30   :  { %1908 = vmatmul.mubr.f32.gmra.mrb[6].mxu1 %v48_v31  ;;  %v2951_v31 = vld [vmem:[%s3244_s5 + $0x38] sm:$0xff] }
  0x31   :  { %1910 = vmatprep.mubr.f32.mxu1 %v49_v32  ;;  %v2956_v32 = vld [vmem:[%s3244_s5 + $0x40] sm:$0xff] }
  0x34   :  { %1911 = vmatmul.mubr.f32.gmra.mrb[8].mxu1 %v50_v33  ;;  %v2963_v33 = vld [vmem:[%s3244_s5 + $0x48] sm:$0xff] }
  0x35   :  { %1913 = vmatprep.mubr.f32.mxu1 %v51_v34  ;;  %v2968_v34 = vld [vmem:[%s3244_s5 + $0x50] sm:$0xff] }
  0x38   :  { %1914 = vmatmul.mubr.f32.gmra.mrb[10].mxu1 %v52_v35  ;;  %v2975_v35 = vld [vmem:[%s3244_s5 + $0x58] sm:$0xff] }
  0x39   :  { %1916 = vmatprep.mubr.f32.mxu1 %v53_v36  ;;  %v2980_v36 = vld [vmem:[%s3244_s5 + $0x60] sm:$0xff] }
  0x3c   :  { %1917 = vmatmul.mubr.f32.gmra.mrb[12].mxu1 %v54_v37  ;;  %v2987_v37 = vld [vmem:[%s3244_s5 + $0x68] sm:$0xff] }
  0x3d   :  { %1919 = vmatprep.mubr.f32.mxu1 %v55_v38  ;;  %v2992_v38 = vld [vmem:[%s3244_s5 + $0x70] sm:$0xff] }
  0x40   :  { %1920 = vmatmul.mubr.f32.gmra.mrb[14].mxu1 %v56_v39  ;;  %v2999_v39 = vld [vmem:[%s3244_s5 + $0x78] sm:$0xff] }
  0x41   :  { %1954 = vmatprep.mubr.f32.mxu1 %v2861_v40 }
  0xf7   :  { %v1900_v1 = vpop.f32.mrb[0].mxu1 }
  0xf8   :  { %v139_v2 = vpop.f32.mrb[1].mxu1 }
  0xf9   :  { %v2402_v3 = vpack.c.bf16 %v1900_v1, %v139_v2  ;;  %v2506_v1 = vpack.c.bf16 %v674_v0, %v673_v63  ;;  %v675_v2 = vld [vmem:[%s3246_s3 + $0x30] sm:$0xff] }
  0xfb   :  { %v1903_v4 = vpop.f32.mrb[2].mxu1  ;;  %2403 = vmatprep.subr.bf16.mxu1 %v2402_v3 }
  0xfc   :  { %v149_v5 = vpop.f32.mrb[3].mxu1  ;;  %2405 = vmatpush3.bf16.msra.mxu1 %v2402_v3  ;;  %v676_v3 = vld [vmem:[%s3246_s3 + $0x38] sm:$0xff] }
  0xfd   :  { %v2406_v6 = vpack.c.bf16 %v1903_v4, %v149_v5  ;;  %v2510_v4 = vpack.c.bf16 %v676_v3, %v675_v2  ;;  %v677_v5 = vld [vmem:[%s3246_s3 + $0x40] sm:$0xff] }
  0xff   :  { %v1906_v7 = vpop.f32.mrb[4].mxu1  ;;  %2407 = vmatprep.subr.bf16.mxu1 %v2406_v6 }
 0x100   :  { %v159_v8 = vpop.f32.mrb[5].mxu1  ;;  %2409 = vmatpush3.bf16.msra.mxu1 %v2406_v6  ;;  %v678_v6 = vld [vmem:[%s3246_s3 + $0x48] sm:$0xff] }
 0x101   :  { %v2410_v9 = vpack.c.bf16 %v1906_v7, %v159_v8  ;;  %v2514_v7 = vpack.c.bf16 %v678_v6, %v677_v5  ;;  %v679_v8 = vld [vmem:[%s3246_s3 + $0x50] sm:$0xff] }
 0x103   :  { %v1909_v10 = vpop.f32.mrb[6].mxu1  ;;  %2411 = vmatprep.subr.bf16.mxu1 %v2410_v9 }
 0x104   :  { %v169_v11 = vpop.f32.mrb[7].mxu1  ;;  %2413 = vmatpush3.bf16.msra.mxu1 %v2410_v9  ;;  %v680_v9 = vld [vmem:[%s3246_s3 + $0x58] sm:$0xff] }
 0x105   :  { %v2414_v12 = vpack.c.bf16 %v1909_v10, %v169_v11  ;;  %v2518_v10 = vpack.c.bf16 %v680_v9, %v679_v8  ;;  %v681_v11 = vld [vmem:[%s3246_s3 + $0x60] sm:$0xff] }
 0x106   :  { %v975_v9 = vld [vmem:[%s3247_s4] sm:$0xff] }
 0x107   :  { %v1912_v13 = vpop.f32.mrb[8].mxu1  ;;  %2415 = vmatprep.subr.bf16.mxu1 %v2414_v12 }
 0x108   :  { %v179_v14 = vpop.f32.mrb[9].mxu1  ;;  %2417 = vmatpush3.bf16.msra.mxu1 %v2414_v12  ;;  %v682_v12 = vld [vmem:[%s3246_s3 + $0x68] sm:$0xff] }
 0x109   :  { %v2418_v15 = vpack.c.bf16 %v1912_v13, %v179_v14  ;;  %v2522_v13 = vpack.c.bf16 %v682_v12, %v681_v11  ;;  %v683_v14 = vld [vmem:[%s3246_s3 + $0x70] sm:$0xff] }
 0x10a   :  { %v977_v11 = vld [vmem:[%s3247_s4 + $0x10] sm:$0xff] }
 0x10b   :  { %v1915_v16 = vpop.f32.mrb[10].mxu1  ;;  %2419 = vmatprep.subr.bf16.mxu1 %v2418_v15 }
 0x10c   :  { %v189_v17 = vpop.f32.mrb[11].mxu1  ;;  %2421 = vmatpush3.bf16.msra.mxu1 %v2418_v15  ;;  %v684_v15 = vld [vmem:[%s3246_s3 + $0x78] sm:$0xff] }
 0x10d   :  { %v2422_v18 = vpack.c.bf16 %v1915_v16, %v189_v17  ;;  %v2526_v16 = vpack.c.bf16 %v684_v15, %v683_v14  ;;  %v979_v15 = vld [vmem:[%s3247_s4 + $0x20] sm:$0xff] }
 0x10f   :  { %v1918_v19 = vpop.f32.mrb[12].mxu1  ;;  %2423 = vmatprep.subr.bf16.mxu1 %v2422_v18 }
 0x110   :  { %v199_v20 = vpop.f32.mrb[13].mxu1  ;;  %2425 = vmatpush3.bf16.msra.mxu1 %v2422_v18 }
 0x111   :  { %v2426_v21 = vpack.c.bf16 %v1918_v19, %v199_v20 }
 0x113   :  { %v1921_v22 = vpop.f32.mrb[14].mxu1  ;;  %2427 = vmatprep.subr.bf16.mxu1 %v2426_v21 }
 0x114   :  { %v209_v23 = vpop.f32.mrb[15].mxu1  ;;  %2429 = vmatpush3.bf16.msra.mxu1 %v2426_v21 }
 0x115   :  { %v2430_v24 = vpack.c.bf16 %v1921_v22, %v209_v23 }
 0x117   :  { %2431 = vmatprep.subr.bf16.mxu1 %v2430_v24 }
 0x118   :  { %2433 = vmatpush3.bf16.msra.mxu1 %v2430_v24 }
 0x11b   :  { %1955 = vmatmul.mubr.f32.vlgmr.msra.gmra.mrb[16].mxu1 %v2915_v25 }
 0x11c   :  { %1957 = vmatprep.mubr.f32.mxu1 %v2920_v26 }
 0x11f   :  { %1958 = vmatmul.mubr.f32.gmra.mrb[18].mxu1 %v2927_v27 }
 0x120   :  { %1960 = vmatprep.mubr.f32.mxu1 %v2932_v28 }
 0x123   :  { %1961 = vmatmul.mubr.f32.gmra.mrb[20].mxu1 %v2939_v29 }
 0x124   :  { %1963 = vmatprep.mubr.f32.mxu1 %v2944_v30 }
 0x127   :  { %1964 = vmatmul.mubr.f32.gmra.mrb[22].mxu1 %v2951_v31 }
 0x128   :  { %1966 = vmatprep.mubr.f32.mxu1 %v2956_v32 }
 0x12b   :  { %1967 = vmatmul.mubr.f32.gmra.mrb[24].mxu1 %v2963_v33 }
 0x12c   :  { %1969 = vmatprep.mubr.f32.mxu1 %v2968_v34 }
 0x12f   :  { %1970 = vmatmul.mubr.f32.gmra.mrb[26].mxu1 %v2975_v35 }
 0x130   :  { %1972 = vmatprep.mubr.f32.mxu1 %v2980_v36 }
 0x133   :  { %1973 = vmatmul.mubr.f32.gmra.mrb[28].mxu1 %v2987_v37 }
 0x134   :  { %1975 = vmatprep.mubr.f32.mxu1 %v2992_v38 }
 0x137   :  { %1976 = vmatmul.mubr.f32.gmra.mrb[30].mxu1 %v2999_v39 }
 0x138   :  { %2066 = vmatprep.mubr.f32.mxu1 %v2861_v40 }
 0x1ee   :  { %v1956_v41 = vpop.f32.mrb[16].mxu1 }
 0x1ef   :  { %v284_v42 = vpop.f32.mrb[17].mxu1 }
 0x1f0   :  { %2010 = vmatprep.mubr.f32.mxu0 %v284_v42 }
 0x1f1   :  { %2011 = vmatmul.mubr.f32.vlgmr.msra.gmra.mrb[0].mxu0 %v1956_v41 }
 0x1f2   :  { %v1959_v43 = vpop.f32.mrb[18].mxu1  ;;  %2501 = vmatpush3.bf16.msra.mxu0 %v2498_v60 }
 0x1f3   :  { %v294_v44 = vpop.f32.mrb[19].mxu1  ;;  %2503 = vmatprep.subr.bf16.mxu0 %v2502_v62 }
 0x1f4   :  { %2013 = vmatprep.mubr.f32.mxu0 %v294_v44 }
 0x1f5   :  { %2014 = vmatmul.mubr.f32.gmra.mrb[2].mxu0 %v1959_v43 }
 0x1f6   :  { %v1962_v45 = vpop.f32.mrb[20].mxu1  ;;  %2505 = vmatpush3.bf16.msra.mxu0 %v2502_v62 }
 0x1f7   :  { %v304_v46 = vpop.f32.mrb[21].mxu1  ;;  %2507 = vmatprep.subr.bf16.mxu0 %v2506_v1 }
 0x1f8   :  { %2016 = vmatprep.mubr.f32.mxu0 %v304_v46 }
 0x1f9   :  { %2017 = vmatmul.mubr.f32.gmra.mrb[4].mxu0 %v1962_v45 }
 0x1fa   :  { %v1965_v47 = vpop.f32.mrb[22].mxu1  ;;  %2509 = vmatpush3.bf16.msra.mxu0 %v2506_v1 }
 0x1fb   :  { %v314_v48 = vpop.f32.mrb[23].mxu1  ;;  %2511 = vmatprep.subr.bf16.mxu0 %v2510_v4 }
 0x1fc   :  { %2019 = vmatprep.mubr.f32.mxu0 %v314_v48 }
 0x1fd   :  { %2020 = vmatmul.mubr.f32.gmra.mrb[6].mxu0 %v1965_v47 }
 0x1fe   :  { %v1968_v49 = vpop.f32.mrb[24].mxu1  ;;  %2513 = vmatpush3.bf16.msra.mxu0 %v2510_v4 }
 0x1ff   :  { %v324_v50 = vpop.f32.mrb[25].mxu1  ;;  %2515 = vmatprep.subr.bf16.mxu0 %v2514_v7 }
 0x200   :  { %2022 = vmatprep.mubr.f32.mxu0 %v324_v50 }
 0x201   :  { %2023 = vmatmul.mubr.f32.gmra.mrb[8].mxu0 %v1968_v49 }
 0x202   :  { %v1971_v51 = vpop.f32.mrb[26].mxu1  ;;  %2517 = vmatpush3.bf16.msra.mxu0 %v2514_v7 }
 0x203   :  { %v334_v52 = vpop.f32.mrb[27].mxu1  ;;  %2519 = vmatprep.subr.bf16.mxu0 %v2518_v10 }
 0x204   :  { %2025 = vmatprep.mubr.f32.mxu0 %v334_v52 }
 0x205   :  { %2026 = vmatmul.mubr.f32.gmra.mrb[10].mxu0 %v1971_v51 }
 0x206   :  { %v1974_v53 = vpop.f32.mrb[28].mxu1  ;;  %2521 = vmatpush3.bf16.msra.mxu0 %v2518_v10  ;;  %v976_v10 = vld [vmem:[%s3247_s4 + $0x8] sm:$0xff] }
 0x207   :  { %v344_v54 = vpop.f32.mrb[29].mxu1  ;;  %2523 = vmatprep.subr.bf16.mxu0 %v2522_v13  ;;  %v2562_v12 = vpack.c.bf16 %v976_v10, %v975_v9 }
 0x208   :  { %2028 = vmatprep.mubr.f32.mxu0 %v344_v54 }
 0x209   :  { %2029 = vmatmul.mubr.f32.gmra.mrb[12].mxu0 %v1974_v53 }
 0x20a   :  { %v1977_v55 = vpop.f32.mrb[30].mxu1  ;;  %2525 = vmatpush3.bf16.msra.mxu0 %v2522_v13  ;;  %v978_v13 = vld [vmem:[%s3247_s4 + $0x18] sm:$0xff] }
 0x20b   :  { %v354_v56 = vpop.f32.mrb[31].mxu1  ;;  %2527 = vmatprep.subr.bf16.mxu0 %v2526_v16  ;;  %v2566_v14 = vpack.c.bf16 %v978_v13, %v977_v11 }
 0x20c   :  { %2031 = vmatprep.mubr.f32.mxu0 %v354_v56 }
 0x20d   :  { %2032 = vmatmul.mubr.f32.gmra.mrb[14].mxu0 %v1977_v55 }
 0x20e   :  { %2529 = vmatpush3.bf16.msra.mxu0 %v2526_v16  ;;  %v980_v16 = vld [vmem:[%s3247_s4 + $0x28] sm:$0xff] }
 0x20f   :  { %2563 = vmatprep.subr.bf16.mxu0 %v2562_v12 }
 0x2c4   :  { %v2012_v17 = vpop.f32.mrb[0].mxu0 }
 0x2c5   :  { %v445_v18 = vpop.f32.mrb[1].mxu0 }
 0x2c6   :  { %v2466_v19 = vpack.c.bf16 %v2012_v17, %v445_v18  ;;  %v2570_v17 = vpack.c.bf16 %v980_v16, %v979_v15  ;;  %v981_v18 = vld [vmem:[%s3247_s4 + $0x30] sm:$0xff] }
 0x2c8   :  { %v2015_v20 = vpop.f32.mrb[2].mxu0  ;;  %2467 = vmatprep.subr.bf16.mxu1 %v2466_v19 }
 0x2c9   :  { %v455_v21 = vpop.f32.mrb[3].mxu0  ;;  %2469 = vmatpush3.bf16.msra.mxu1 %v2466_v19  ;;  %v982_v19 = vld [vmem:[%s3247_s4 + $0x38] sm:$0xff] }
 0x2ca   :  { %v2470_v22 = vpack.c.bf16 %v2015_v20, %v455_v21  ;;  %v2574_v20 = vpack.c.bf16 %v982_v19, %v981_v18  ;;  %v983_v21 = vld [vmem:[%s3247_s4 + $0x40] sm:$0xff] }
 0x2cc   :  { %v2018_v23 = vpop.f32.mrb[4].mxu0  ;;  %2471 = vmatprep.subr.bf16.mxu1 %v2470_v22 }
 0x2cd   :  { %v465_v24 = vpop.f32.mrb[5].mxu0  ;;  %2473 = vmatpush3.bf16.msra.mxu1 %v2470_v22  ;;  %v984_v22 = vld [vmem:[%s3247_s4 + $0x48] sm:$0xff] }
 0x2ce   :  { %v2474_v41 = vpack.c.bf16 %v2018_v23, %v465_v24  ;;  %v2578_v23 = vpack.c.bf16 %v984_v22, %v983_v21  ;;  %v985_v24 = vld [vmem:[%s3247_s4 + $0x50] sm:$0xff] }
 0x2d0   :  { %v2021_v42 = vpop.f32.mrb[6].mxu0  ;;  %2475 = vmatprep.subr.bf16.mxu1 %v2474_v41 }
 0x2d1   :  { %v475_v43 = vpop.f32.mrb[7].mxu0  ;;  %2477 = vmatpush3.bf16.msra.mxu1 %v2474_v41  ;;  %v986_v41 = vld [vmem:[%s3247_s4 + $0x58] sm:$0xff] }
 0x2d2   :  { %v2478_v44 = vpack.c.bf16 %v2021_v42, %v475_v43  ;;  %v2582_v42 = vpack.c.bf16 %v986_v41, %v985_v24  ;;  %v987_v43 = vld [vmem:[%s3247_s4 + $0x60] sm:$0xff] }
 0x2d4   :  { %v2024_v45 = vpop.f32.mrb[8].mxu0  ;;  %2479 = vmatprep.subr.bf16.mxu1 %v2478_v44 }
 0x2d5   :  { %v485_v46 = vpop.f32.mrb[9].mxu0  ;;  %2481 = vmatpush3.bf16.msra.mxu1 %v2478_v44  ;;  %v988_v44 = vld [vmem:[%s3247_s4 + $0x68] sm:$0xff] }
 0x2d6   :  { %v2482_v47 = vpack.c.bf16 %v2024_v45, %v485_v46  ;;  %v2586_v45 = vpack.c.bf16 %v988_v44, %v987_v43  ;;  %v989_v46 = vld [vmem:[%s3247_s4 + $0x70] sm:$0xff] }
 0x2d8   :  { %v2027_v48 = vpop.f32.mrb[10].mxu0  ;;  %2483 = vmatprep.subr.bf16.mxu1 %v2482_v47 }
 0x2d9   :  { %v495_v49 = vpop.f32.mrb[11].mxu0  ;;  %2485 = vmatpush3.bf16.msra.mxu1 %v2482_v47  ;;  %v990_v47 = vld [vmem:[%s3247_s4 + $0x78] sm:$0xff] }
 0x2da   :  { %v2486_v50 = vpack.c.bf16 %v2027_v48, %v495_v49  ;;  %v2590_v48 = vpack.c.bf16 %v990_v47, %v989_v46 }
 0x2dc   :  { %v2030_v51 = vpop.f32.mrb[12].mxu0  ;;  %2487 = vmatprep.subr.bf16.mxu1 %v2486_v50 }
 0x2dd   :  { %v505_v52 = vpop.f32.mrb[13].mxu0  ;;  %2489 = vmatpush3.bf16.msra.mxu1 %v2486_v50 }
 0x2de   :  { %v2490_v53 = vpack.c.bf16 %v2030_v51, %v505_v52 }
 0x2e0   :  { %v2033_v54 = vpop.f32.mrb[14].mxu0  ;;  %2491 = vmatprep.subr.bf16.mxu1 %v2490_v53 }
 0x2e1   :  { %v515_v55 = vpop.f32.mrb[15].mxu0  ;;  %2493 = vmatpush3.bf16.msra.mxu1 %v2490_v53 }
 0x2e2   :  { %v2494_v56 = vpack.c.bf16 %v2033_v54, %v515_v55 }
 0x2e4   :  { %2495 = vmatprep.subr.bf16.mxu1 %v2494_v56 }
 0x2e5   :  { %2497 = vmatpush3.bf16.msra.mxu1 %v2494_v56 }
 0x2e8   :  { %2067 = vmatmul.mubr.f32.vlgmr.msra.gmra.mrb[32].mxu1 %v2915_v25 }
 0x2e9   :  { %2069 = vmatprep.mubr.f32.mxu1 %v2920_v26 }
 0x2ec   :  { %2070 = vmatmul.mubr.f32.gmra.mrb[34].mxu1 %v2927_v27 }
 0x2ed   :  { %2072 = vmatprep.mubr.f32.mxu1 %v2932_v28 }
 0x2f0   :  { %2073 = vmatmul.mubr.f32.gmra.mrb[36].mxu1 %v2939_v29 }
 0x2f1   :  { %2075 = vmatprep.mubr.f32.mxu1 %v2944_v30 }
 0x2f4   :  { %2076 = vmatmul.mubr.f32.gmra.mrb[38].mxu1 %v2951_v31 }
 0x2f5   :  { %2078 = vmatprep.mubr.f32.mxu1 %v2956_v32 }
 0x2f8   :  { %2079 = vmatmul.mubr.f32.gmra.mrb[40].mxu1 %v2963_v33 }
 0x2f9   :  { %2081 = vmatprep.mubr.f32.mxu1 %v2968_v34 }
 0x2fc   :  { %2082 = vmatmul.mubr.f32.gmra.mrb[42].mxu1 %v2975_v35 }
 0x2fd   :  { %2084 = vmatprep.mubr.f32.mxu1 %v2980_v36 }
 0x300   :  { %2085 = vmatmul.mubr.f32.gmra.mrb[44].mxu1 %v2987_v37 }
 0x301   :  { %2087 = vmatprep.mubr.f32.mxu1 %v2992_v38 }
 0x304   :  { %2088 = vmatmul.mubr.f32.gmra.mrb[46].mxu1 %v2999_v39 }
 0x305   :  { %2178 = vmatprep.mubr.f32.mxu1 %v2861_v40 }
 0x3bb   :  { %v2068_v57 = vpop.f32.mrb[32].mxu1 }
 0x3bc   :  { %v590_v58 = vpop.f32.mrb[33].mxu1 }
 0x3bd   :  { %2122 = vmatprep.mubr.f32.mxu0 %v590_v58 }
 0x3be   :  { %2123 = vmatmul.mubr.f32.vlgmr.msra.gmra.mrb[16].mxu0 %v2068_v57 }
 0x3bf   :  { %v2071_v59 = vpop.f32.mrb[34].mxu1  ;;  %2565 = vmatpush3.bf16.msra.mxu0 %v2562_v12 }
 0x3c0   :  { %v600_v60 = vpop.f32.mrb[35].mxu1  ;;  %2567 = vmatprep.subr.bf16.mxu0 %v2566_v14 }
 0x3c1   :  { %2125 = vmatprep.mubr.f32.mxu0 %v600_v60 }
 0x3c2   :  { %2126 = vmatmul.mubr.f32.gmra.mrb[18].mxu0 %v2071_v59 }
 0x3c3   :  { %v2074_v61 = vpop.f32.mrb[36].mxu1  ;;  %2569 = vmatpush3.bf16.msra.mxu0 %v2566_v14 }
 0x3c4   :  { %v610_v62 = vpop.f32.mrb[37].mxu1  ;;  %2571 = vmatprep.subr.bf16.mxu0 %v2570_v17 }
 0x3c5   :  { %2128 = vmatprep.mubr.f32.mxu0 %v610_v62 }
 0x3c6   :  { %2129 = vmatmul.mubr.f32.gmra.mrb[20].mxu0 %v2074_v61 }
 0x3c7   :  { %v2077_v63 = vpop.f32.mrb[38].mxu1  ;;  %2573 = vmatpush3.bf16.msra.mxu0 %v2570_v17 }
 0x3c8   :  { %v620_v0 = vpop.f32.mrb[39].mxu1  ;;  %2575 = vmatprep.subr.bf16.mxu0 %v2574_v20 }
 0x3c9   :  { %2131 = vmatprep.mubr.f32.mxu0 %v620_v0 }
 0x3ca   :  { %2132 = vmatmul.mubr.f32.gmra.mrb[22].mxu0 %v2077_v63 }
 0x3cb   :  { %v2080_v1 = vpop.f32.mrb[40].mxu1  ;;  %2577 = vmatpush3.bf16.msra.mxu0 %v2574_v20 }
 0x3cc   :  { %v630_v2 = vpop.f32.mrb[41].mxu1  ;;  %2579 = vmatprep.subr.bf16.mxu0 %v2578_v23 }
 0x3cd   :  { %2134 = vmatprep.mubr.f32.mxu0 %v630_v2 }
 0x3ce   :  { %2135 = vmatmul.mubr.f32.gmra.mrb[24].mxu0 %v2080_v1 }
 0x3cf   :  { %v2083_v3 = vpop.f32.mrb[42].mxu1  ;;  %2581 = vmatpush3.bf16.msra.mxu0 %v2578_v23 }
 0x3d0   :  { %v640_v4 = vpop.f32.mrb[43].mxu1  ;;  %2583 = vmatprep.subr.bf16.mxu0 %v2582_v42 }
 0x3d1   :  { %2137 = vmatprep.mubr.f32.mxu0 %v640_v4 }
 0x3d2   :  { %2138 = vmatmul.mubr.f32.gmra.mrb[26].mxu0 %v2083_v3 }
 0x3d3   :  { %v2086_v5 = vpop.f32.mrb[44].mxu1  ;;  %2585 = vmatpush3.bf16.msra.mxu0 %v2582_v42 }
 0x3d4   :  { %v650_v6 = vpop.f32.mrb[45].mxu1  ;;  %2587 = vmatprep.subr.bf16.mxu0 %v2586_v45 }
 0x3d5   :  { %2140 = vmatprep.mubr.f32.mxu0 %v650_v6 }
 0x3d6   :  { %2141 = vmatmul.mubr.f32.gmra.mrb[28].mxu0 %v2086_v5 }
 0x3d7   :  { %v2089_v7 = vpop.f32.mrb[46].mxu1  ;;  %2589 = vmatpush3.bf16.msra.mxu0 %v2586_v45 }
 0x3d8   :  { %v660_v8 = vpop.f32.mrb[47].mxu1  ;;  %2591 = vmatprep.subr.bf16.mxu0 %v2590_v48 }
 0x3d9   :  { %2143 = vmatprep.mubr.f32.mxu0 %v660_v8 }
 0x3da   :  { %2144 = vmatmul.mubr.f32.gmra.mrb[30].mxu0 %v2089_v7 }
 0x3db   :  { %2593 = vmatpush3.bf16.msra.mxu0 %v2590_v48 }
 0x491   :  { %v2124_v49 = vpop.f32.mrb[16].mxu0 }
 0x492   :  { %v751_v50 = vpop.f32.mrb[17].mxu0 }
 0x493   :  { %v2530_v51 = vpack.c.bf16 %v2124_v49, %v751_v50 }
 0x495   :  { %v2127_v52 = vpop.f32.mrb[18].mxu0  ;;  %2531 = vmatprep.subr.bf16.mxu1 %v2530_v51 }
 0x496   :  { %v761_v53 = vpop.f32.mrb[19].mxu0  ;;  %2533 = vmatpush3.bf16.msra.mxu1 %v2530_v51 }
 0x497   :  { %v2534_v54 = vpack.c.bf16 %v2127_v52, %v761_v53 }
 0x499   :  { %v2130_v55 = vpop.f32.mrb[20].mxu0  ;;  %2535 = vmatprep.subr.bf16.mxu1 %v2534_v54 }
 0x49a   :  { %v771_v56 = vpop.f32.mrb[21].mxu0  ;;  %2537 = vmatpush3.bf16.msra.mxu1 %v2534_v54 }
 0x49b   :  { %v2538_v57 = vpack.c.bf16 %v2130_v55, %v771_v56 }
 0x49d   :  { %v2133_v58 = vpop.f32.mrb[22].mxu0  ;;  %2539 = vmatprep.subr.bf16.mxu1 %v2538_v57 }
 0x49e   :  { %v781_v59 = vpop.f32.mrb[23].mxu0  ;;  %2541 = vmatpush3.bf16.msra.mxu1 %v2538_v57 }
 0x49f   :  { %v2542_v60 = vpack.c.bf16 %v2133_v58, %v781_v59 }
 0x4a1   :  { %v2136_v61 = vpop.f32.mrb[24].mxu0  ;;  %2543 = vmatprep.subr.bf16.mxu1 %v2542_v60 }
 0x4a2   :  { %v791_v62 = vpop.f32.mrb[25].mxu0  ;;  %2545 = vmatpush3.bf16.msra.mxu1 %v2542_v60 }
 0x4a3   :  { %v2546_v63 = vpack.c.bf16 %v2136_v61, %v791_v62 }
 0x4a5   :  { %v2139_v0 = vpop.f32.mrb[26].mxu0  ;;  %2547 = vmatprep.subr.bf16.mxu1 %v2546_v63 }
 0x4a6   :  { %v801_v1 = vpop.f32.mrb[27].mxu0  ;;  %2549 = vmatpush3.bf16.msra.mxu1 %v2546_v63 }
 0x4a7   :  { %v2550_v2 = vpack.c.bf16 %v2139_v0, %v801_v1 }
 0x4a9   :  { %v2142_v3 = vpop.f32.mrb[28].mxu0  ;;  %2551 = vmatprep.subr.bf16.mxu1 %v2550_v2 }
 0x4aa   :  { %v811_v4 = vpop.f32.mrb[29].mxu0  ;;  %2553 = vmatpush3.bf16.msra.mxu1 %v2550_v2 }
 0x4ab   :  { %v2554_v5 = vpack.c.bf16 %v2142_v3, %v811_v4 }
 0x4ad   :  { %v2145_v6 = vpop.f32.mrb[30].mxu0  ;;  %2555 = vmatprep.subr.bf16.mxu1 %v2554_v5 }
 0x4ae   :  { %v821_v7 = vpop.f32.mrb[31].mxu0  ;;  %2557 = vmatpush3.bf16.msra.mxu1 %v2554_v5 }
 0x4af   :  { %v2558_v8 = vpack.c.bf16 %v2145_v6, %v821_v7 }
 0x4b1   :  { %2559 = vmatprep.subr.bf16.mxu1 %v2558_v8 }
 0x4b2   :  { %2561 = vmatpush3.bf16.msra.mxu1 %v2558_v8 }
 0x4b5   :  { %2179 = vmatmul.mubr.f32.vlgmr.msra.gmra.mrb[48].mxu1 %v2915_v25 }
 0x4b6   :  { %2181 = vmatprep.mubr.f32.mxu1 %v2920_v26 }
 0x4b9   :  { %2182 = vmatmul.mubr.f32.gmra.mrb[50].mxu1 %v2927_v27 }
 0x4ba   :  { %2184 = vmatprep.mubr.f32.mxu1 %v2932_v28 }
 0x4bd   :  { %2185 = vmatmul.mubr.f32.gmra.mrb[52].mxu1 %v2939_v29 }
 0x4be   :  { %2187 = vmatprep.mubr.f32.mxu1 %v2944_v30 }
 0x4c1   :  { %2188 = vmatmul.mubr.f32.gmra.mrb[54].mxu1 %v2951_v31 }
 0x4c2   :  { %2190 = vmatprep.mubr.f32.mxu1 %v2956_v32 }
 0x4c5   :  { %2191 = vmatmul.mubr.f32.gmra.mrb[56].mxu1 %v2963_v33 }
 0x4c6   :  { %2193 = vmatprep.mubr.f32.mxu1 %v2968_v34 }
 0x4c9   :  { %2194 = vmatmul.mubr.f32.gmra.mrb[58].mxu1 %v2975_v35 }
 0x4ca   :  { %2196 = vmatprep.mubr.f32.mxu1 %v2980_v36 }
 0x4cd   :  { %2197 = vmatmul.mubr.f32.gmra.mrb[60].mxu1 %v2987_v37 }
 0x4ce   :  { %2199 = vmatprep.mubr.f32.mxu1 %v2992_v38 }
 0x4d1   :  { %2200 = vmatmul.mubr.f32.gmra.mrb[62].mxu1 %v2999_v39 }
 0x4d2   :  { %2290 = vmatprep.mubr.f32.mxu1 %v2861_v40 }
 0x588   :  { %v2180_v9 = vpop.f32.mrb[48].mxu1 }
 0x589   :  { %v896_v10 = vpop.f32.mrb[49].mxu1 }
 0x58a   :  { %2234 = vmatprep.mubr.f32.mxu0 %v896_v10 }
 0x58b   :  { %2235 = vmatmul.mubr.f32.vlgmr.msra.gmra.mrb[32].mxu0 %v2180_v9 }
 0x58c   :  { %v2183_v11 = vpop.f32.mrb[50].mxu1 }
 0x58d   :  { %v906_v12 = vpop.f32.mrb[51].mxu1 }
 0x58e   :  { %2237 = vmatprep.mubr.f32.mxu0 %v906_v12 }
 0x58f   :  { %2238 = vmatmul.mubr.f32.gmra.mrb[34].mxu0 %v2183_v11 }
 0x590   :  { %v2186_v13 = vpop.f32.mrb[52].mxu1 }
 0x591   :  { %v916_v14 = vpop.f32.mrb[53].mxu1 }
 0x592   :  { %2240 = vmatprep.mubr.f32.mxu0 %v916_v14 }
 0x593   :  { %2241 = vmatmul.mubr.f32.gmra.mrb[36].mxu0 %v2186_v13 }
 0x594   :  { %v2189_v15 = vpop.f32.mrb[54].mxu1 }
 0x595   :  { %v926_v16 = vpop.f32.mrb[55].mxu1 }
 0x596   :  { %2243 = vmatprep.mubr.f32.mxu0 %v926_v16 }
 0x597   :  { %2244 = vmatmul.mubr.f32.gmra.mrb[38].mxu0 %v2189_v15 }
 0x598   :  { %v2192_v17 = vpop.f32.mrb[56].mxu1 }
 0x599   :  { %v936_v18 = vpop.f32.mrb[57].mxu1 }
 0x59a   :  { %2246 = vmatprep.mubr.f32.mxu0 %v936_v18 }
 0x59b   :  { %2247 = vmatmul.mubr.f32.gmra.mrb[40].mxu0 %v2192_v17 }
 0x59c   :  { %v2195_v40 = vpop.f32.mrb[58].mxu1 }
 0x59d   :  { %v946_v19 = vpop.f32.mrb[59].mxu1 }
 0x59e   :  { %2249 = vmatprep.mubr.f32.mxu0 %v946_v19 }
 0x59f   :  { %2250 = vmatmul.mubr.f32.gmra.mrb[42].mxu0 %v2195_v40 }
 0x5a0   :  { %v2198_v20 = vpop.f32.mrb[60].mxu1 }
 0x5a1   :  { %v956_v21 = vpop.f32.mrb[61].mxu1 }
 0x5a2   :  { %2252 = vmatprep.mubr.f32.mxu0 %v956_v21 }
 0x5a3   :  { %2253 = vmatmul.mubr.f32.gmra.mrb[44].mxu0 %v2198_v20 }
 0x5a4   :  { %v2201_v22 = vpop.f32.mrb[62].mxu1 }
 0x5a5   :  { %v966_v23 = vpop.f32.mrb[63].mxu1 }
 0x5a6   :  { %2255 = vmatprep.mubr.f32.mxu0 %v966_v23 }
 0x5a7   :  { %2256 = vmatmul.mubr.f32.gmra.mrb[46].mxu0 %v2201_v22 }
 0x65e   :  { %v2236_v24 = vpop.f32.mrb[32].mxu0 }
 0x65f   :  { %v1057_v41 = vpop.f32.mrb[33].mxu0 }
 0x660   :  { %v2594_v42 = vpack.c.bf16 %v2236_v24, %v1057_v41 }
 0x662   :  { %v2239_v43 = vpop.f32.mrb[34].mxu0  ;;  %2595 = vmatprep.subr.bf16.mxu1 %v2594_v42 }
 0x663   :  { %v1067_v44 = vpop.f32.mrb[35].mxu0  ;;  %2597 = vmatpush3.bf16.msra.mxu1 %v2594_v42 }
 0x664   :  { %v2598_v45 = vpack.c.bf16 %v2239_v43, %v1067_v44 }
 0x666   :  { %v2242_v46 = vpop.f32.mrb[36].mxu0  ;;  %2599 = vmatprep.subr.bf16.mxu1 %v2598_v45 }
 0x667   :  { %v1077_v47 = vpop.f32.mrb[37].mxu0  ;;  %2601 = vmatpush3.bf16.msra.mxu1 %v2598_v45 }
 0x668   :  { %v2602_v48 = vpack.c.bf16 %v2242_v46, %v1077_v47 }
 0x66a   :  { %v2245_v49 = vpop.f32.mrb[38].mxu0  ;;  %2603 = vmatprep.subr.bf16.mxu1 %v2602_v48 }
 0x66b   :  { %v1087_v50 = vpop.f32.mrb[39].mxu0  ;;  %2605 = vmatpush3.bf16.msra.mxu1 %v2602_v48 }
 0x66c   :  { %v2606_v51 = vpack.c.bf16 %v2245_v49, %v1087_v50 }
 0x66e   :  { %v2248_v52 = vpop.f32.mrb[40].mxu0  ;;  %2607 = vmatprep.subr.bf16.mxu1 %v2606_v51 }
 0x66f   :  { %v1097_v53 = vpop.f32.mrb[41].mxu0  ;;  %2609 = vmatpush3.bf16.msra.mxu1 %v2606_v51 }
 0x670   :  { %v2610_v54 = vpack.c.bf16 %v2248_v52, %v1097_v53 }
 0x672   :  { %v2251_v55 = vpop.f32.mrb[42].mxu0  ;;  %2611 = vmatprep.subr.bf16.mxu1 %v2610_v54 }
 0x673   :  { %v1107_v56 = vpop.f32.mrb[43].mxu0  ;;  %2613 = vmatpush3.bf16.msra.mxu1 %v2610_v54 }
 0x674   :  { %v2614_v57 = vpack.c.bf16 %v2251_v55, %v1107_v56 }
 0x676   :  { %v2254_v58 = vpop.f32.mrb[44].mxu0  ;;  %2615 = vmatprep.subr.bf16.mxu1 %v2614_v57 }
 0x677   :  { %v1117_v59 = vpop.f32.mrb[45].mxu0  ;;  %2617 = vmatpush3.bf16.msra.mxu1 %v2614_v57 }
 0x678   :  { %v2618_v60 = vpack.c.bf16 %v2254_v58, %v1117_v59 }
 0x67a   :  { %v2257_v61 = vpop.f32.mrb[46].mxu0  ;;  %2619 = vmatprep.subr.bf16.mxu1 %v2618_v60 }
 0x67b   :  { %v1127_v62 = vpop.f32.mrb[47].mxu0  ;;  %2621 = vmatpush3.bf16.msra.mxu1 %v2618_v60 }
 0x67c   :  { %v2622_v63 = vpack.c.bf16 %v2257_v61, %v1127_v62 }
 0x67e   :  { %2623 = vmatprep.subr.bf16.mxu1 %v2622_v63 }
 0x67f   :  { %2625 = vmatpush3.bf16.msra.mxu1 %v2622_v63 }
 0x682   :  { %2291 = vmatmul.mubr.f32.vlgmr.msra.gmra.mrb[64].mxu1 %v2915_v25 }
 0x683   :  { %2293 = vmatprep.mubr.f32.mxu1 %v2920_v26 }
 0x686   :  { %2294 = vmatmul.mubr.f32.gmra.mrb[66].mxu1 %v2927_v27 }
 0x687   :  { %2296 = vmatprep.mubr.f32.mxu1 %v2932_v28 }
 0x68a   :  { %2297 = vmatmul.mubr.f32.gmra.mrb[68].mxu1 %v2939_v29 }
 0x68b   :  { %2299 = vmatprep.mubr.f32.mxu1 %v2944_v30 }
 0x68e   :  { %2300 = vmatmul.mubr.f32.gmra.mrb[70].mxu1 %v2951_v31 }
 0x68f   :  { %2302 = vmatprep.mubr.f32.mxu1 %v2956_v32 }
 0x692   :  { %2303 = vmatmul.mubr.f32.gmra.mrb[72].mxu1 %v2963_v33 }
 0x693   :  { %2305 = vmatprep.mubr.f32.mxu1 %v2968_v34 }
 0x696   :  { %2306 = vmatmul.mubr.f32.gmra.mrb[74].mxu1 %v2975_v35 }
 0x697   :  { %2308 = vmatprep.mubr.f32.mxu1 %v2980_v36 }
 0x69a   :  { %2309 = vmatmul.mubr.f32.gmra.mrb[76].mxu1 %v2987_v37 }
 0x69b   :  { %2311 = vmatprep.mubr.f32.mxu1 %v2992_v38 }
 0x69e   :  { %2312 = vmatmul.mubr.f32.gmra.mrb[78].mxu1 %v2999_v39 }
 0x755   :  { %v2292_v25 = vpop.f32.mrb[64].mxu1 }
 0x756   :  { %1282 = vst [vmem:[%s3248_s6 + $0x8] sm:$0xff] %v2292_v25  ;;  %v1202_v26 = vpop.f32.mrb[65].mxu1 }
 0x757   :  { %1281 = vst [vmem:[%s3248_s6] sm:$0xff] %v1202_v26  ;;  %v2626_v27 = vpack.c.bf16 %v2292_v25, %v1202_v26  ;;  %2346 = vmatprep.mubr.f32.mxu0 %v1202_v26 }
 0x759   :  { %2627 = vmatprep.subr.bf16.mxu0 %v2626_v27  ;;  %v2295_v28 = vpop.f32.mrb[66].mxu1 }
 0x75a   :  { %2629 = vmatpush3.bf16.xpose.msra.mxu0 %v2626_v27  ;;  %1284 = vst [vmem:[%s3248_s6 + $0x18] sm:$0xff] %v2295_v28  ;;  %v1212_v29 = vpop.f32.mrb[67].mxu1 }
 0x75b   :  { %1283 = vst [vmem:[%s3248_s6 + $0x10] sm:$0xff] %v1212_v29  ;;  %v2630_v30 = vpack.c.bf16 %v2295_v28, %v1212_v29 }
 0x75d   :  { %2631 = vmatprep.subr.bf16.mxu0 %v2630_v30  ;;  %v2298_v31 = vpop.f32.mrb[68].mxu1 }
 0x75e   :  { %1286 = vst [vmem:[%s3248_s6 + $0x28] sm:$0xff] %v2298_v31  ;;  %v1222_v32 = vpop.f32.mrb[69].mxu1 }
 0x75f   :  { %1285 = vst [vmem:[%s3248_s6 + $0x20] sm:$0xff] %v1222_v32  ;;  %v2634_v33 = vpack.c.bf16 %v2298_v31, %v1222_v32 }
 0x761   :  { %v2301_v34 = vpop.f32.mrb[70].mxu1 }
 0x762   :  { %2633 = vmatpush3.bf16.xpose.msra.mxu0 %v2630_v30  ;;  %1288 = vst [vmem:[%s3248_s6 + $0x38] sm:$0xff] %v2301_v34  ;;  %v1232_v35 = vpop.f32.mrb[71].mxu1 }
 0x763   :  { %2635 = vmatprep.subr.bf16.mxu0 %v2634_v33  ;;  %1287 = vst [vmem:[%s3248_s6 + $0x30] sm:$0xff] %v1232_v35  ;;  %v2638_v36 = vpack.c.bf16 %v2301_v34, %v1232_v35 }
 0x765   :  { %v2304_v37 = vpop.f32.mrb[72].mxu1 }
 0x766   :  { %1290 = vst [vmem:[%s3248_s6 + $0x48] sm:$0xff] %v2304_v37  ;;  %v1242_v38 = vpop.f32.mrb[73].mxu1 }
 0x767   :  { %1289 = vst [vmem:[%s3248_s6 + $0x40] sm:$0xff] %v1242_v38  ;;  %v2642_v39 = vpack.c.bf16 %v2304_v37, %v1242_v38 }
 0x769   :  { %v2307_v0 = vpop.f32.mrb[74].mxu1 }
 0x76a   :  { %2637 = vmatpush3.bf16.xpose.msra.mxu0 %v2634_v33  ;;  %1292 = vst [vmem:[%s3248_s6 + $0x58] sm:$0xff] %v2307_v0  ;;  %v1252_v1 = vpop.f32.mrb[75].mxu1 }
 0x76b   :  { %2639 = vmatprep.subr.bf16.mxu0 %v2638_v36  ;;  %1291 = vst [vmem:[%s3248_s6 + $0x50] sm:$0xff] %v1252_v1  ;;  %v2646_v2 = vpack.c.bf16 %v2307_v0, %v1252_v1 }
 0x76d   :  { %v2310_v3 = vpop.f32.mrb[76].mxu1 }
 0x76e   :  { %1294 = vst [vmem:[%s3248_s6 + $0x68] sm:$0xff] %v2310_v3  ;;  %v1262_v4 = vpop.f32.mrb[77].mxu1 }
 0x76f   :  { %1293 = vst [vmem:[%s3248_s6 + $0x60] sm:$0xff] %v1262_v4  ;;  %v2650_v5 = vpack.c.bf16 %v2310_v3, %v1262_v4 }
 0x771   :  { %v2313_v6 = vpop.f32.mrb[78].mxu1 }
 0x772   :  { %2641 = vmatpush3.bf16.xpose.msra.mxu0 %v2638_v36  ;;  %1296 = vst [vmem:[%s3248_s6 + $0x78] sm:$0xff] %v2313_v6  ;;  %v1272_v7 = vpop.f32.mrb[79].mxu1 }
 0x773   :  { %2643 = vmatprep.subr.bf16.mxu0 %v2642_v39  ;;  %1295 = vst [vmem:[%s3248_s6 + $0x70] sm:$0xff] %v1272_v7  ;;  %v2654_v8 = vpack.c.bf16 %v2313_v6, %v1272_v7 }
 0x77a   :  { %2645 = vmatpush3.bf16.xpose.msra.mxu0 %v2642_v39 }
 0x77b   :  { %2647 = vmatprep.subr.bf16.mxu0 %v2646_v2 }
 0x782   :  { %2649 = vmatpush3.bf16.xpose.msra.mxu0 %v2646_v2 }
 0x783   :  { %2651 = vmatprep.subr.bf16.mxu0 %v2650_v5 }
 0x78a   :  { %2653 = vmatpush3.bf16.xpose.msra.mxu0 %v2650_v5 }
 0x78b   :  { %2655 = vmatprep.subr.bf16.mxu0 %v2654_v8 }
 0x792   :  { %2657 = vmatpush3.bf16.xpose.msra.mxu0 %v2654_v8 }
 0x799   :  { %2347 = vmatmul.mubr.f32.vlgmr.msra.gmra.mrb[48].mxu0 %v2292_v25 }
 0x79a   :  { %2349 = vmatprep.mubr.f32.mxu0 %v1212_v29 }
 0x79d   :  { %2350 = vmatmul.mubr.f32.gmra.mrb[50].mxu0 %v2295_v28 }
 0x79e   :  { %2352 = vmatprep.mubr.f32.mxu0 %v1222_v32 }
 0x7a1   :  { %2353 = vmatmul.mubr.f32.gmra.mrb[52].mxu0 %v2298_v31 }
 0x7a2   :  { %2355 = vmatprep.mubr.f32.mxu0 %v1232_v35 }
 0x7a5   :  { %2356 = vmatmul.mubr.f32.gmra.mrb[54].mxu0 %v2301_v34 }
 0x7a6   :  { %2358 = vmatprep.mubr.f32.mxu0 %v1242_v38 }
 0x7a9   :  { %2359 = vmatmul.mubr.f32.gmra.mrb[56].mxu0 %v2304_v37 }
 0x7aa   :  { %2361 = vmatprep.mubr.f32.mxu0 %v1252_v1 }
 0x7ad   :  { %2362 = vmatmul.mubr.f32.gmra.mrb[58].mxu0 %v2307_v0 }
 0x7ae   :  { %2364 = vmatprep.mubr.f32.mxu0 %v1262_v4 }
 0x7b1   :  { %2365 = vmatmul.mubr.f32.gmra.mrb[60].mxu0 %v2310_v3 }
 0x7b2   :  { %2367 = vmatprep.mubr.f32.mxu0 %v1272_v7 }
 0x7b5   :  { %2368 = vmatmul.mubr.f32.gmra.mrb[62].mxu0 %v2313_v6 }
 0x86c   :  { %v2348_v9 = vpop.f32.mrb[48].mxu0 }
 0x86d   :  { %v1563_v10 = vmul.f32 -1.442695, %v2348_v9  ;;  %v1363_v11 = vpop.f32.mrb[49].mxu0 }
 0x86e   :  { %v1562_v12 = vmul.f32 -1.442695, %v1363_v11 }
 0x86f   :  { %2658 = vpow2.f32 %v1563_v10 }
 0x870   :  { %2660 = vpow2.f32 %v1562_v12  ;;  %v2351_v13 = vpop.f32.mrb[50].mxu0 }
 0x871   :  { %v1565_v14 = vmul.f32 -1.442695, %v2351_v13  ;;  %v1373_v15 = vpop.f32.mrb[51].mxu0 }
 0x872   :  { %v1564_v16 = vmul.f32 -1.442695, %v1373_v15 }
 0x873   :  { %2662 = vpow2.f32 %v1565_v14 }
 0x874   :  { %2664 = vpow2.f32 %v1564_v16  ;;  %v2354_v17 = vpop.f32.mrb[52].mxu0 }
 0x875   :  { %v1567_v18 = vmul.f32 -1.442695, %v2354_v17  ;;  %v1383_v40 = vpop.f32.mrb[53].mxu0 }
 0x876   :  { %v1566_v19 = vmul.f32 -1.442695, %v1383_v40 }
 0x877   :  { %2666 = vpow2.f32 %v1567_v18 }
 0x878   :  { %2668 = vpow2.f32 %v1566_v19  ;;  %v2357_v20 = vpop.f32.mrb[54].mxu0 }
 0x879   :  { %v2659_v21 = vpop.eup %2658  ;;  %v1569_v22 = vmul.f32 -1.442695, %v2357_v20  ;;  %v1393_v23 = vpop.f32.mrb[55].mxu0 }
 0x87a   :  { %v2661_v24 = vpop.eup %2660  ;;  %v1491_v41 = vadd.f32 1.0, %v2659_v21  ;;  %v1568_v42 = vmul.f32 -1.442695, %v1393_v23 }
 0x87b   :  { %v1490_v43 = vadd.f32 1.0, %v2661_v24  ;;  %2670 = vpow2.f32 %v1569_v22 }
 0x87c   :  { %2672 = vrcp.f32 %v1491_v41  ;;  %v2360_v44 = vpop.f32.mrb[56].mxu0 }
 0x87d   :  { %v2663_v45 = vpop.eup %2662  ;;  %2674 = vrcp.f32 %v1490_v43  ;;  %v1571_v46 = vmul.f32 -1.442695, %v2360_v44  ;;  %v1403_v47 = vpop.f32.mrb[57].mxu0 }
 0x87e   :  { %v2665_v48 = vpop.eup %2664  ;;  %v1493_v49 = vadd.f32 1.0, %v2663_v45  ;;  %2676 = vpow2.f32 %v1568_v42  ;;  %v1570_v50 = vmul.f32 -1.442695, %v1403_v47 }
 0x87f   :  { %v1492_v51 = vadd.f32 1.0, %v2665_v48  ;;  %2678 = vpow2.f32 %v1571_v46 }
 0x880   :  { %2680 = vrcp.f32 %v1493_v49  ;;  %v2363_v52 = vpop.f32.mrb[58].mxu0 }
 0x881   :  { %v2667_v53 = vpop.eup %2666  ;;  %2682 = vrcp.f32 %v1492_v51  ;;  %v1573_v54 = vmul.f32 -1.442695, %v2363_v52  ;;  %v1413_v55 = vpop.f32.mrb[59].mxu0 }
 0x882   :  { %v2669_v56 = vpop.eup %2668  ;;  %v1495_v57 = vadd.f32 1.0, %v2667_v53  ;;  %2684 = vpow2.f32 %v1570_v50  ;;  %v1572_v58 = vmul.f32 -1.442695, %v1413_v55 }
 0x883   :  { %v1494_v59 = vadd.f32 1.0, %v2669_v56  ;;  %2686 = vpow2.f32 %v1573_v54 }
 0x884   :  { %2688 = vrcp.f32 %v1495_v57  ;;  %v2366_v60 = vpop.f32.mrb[60].mxu0 }
 0x885   :  { %v2671_v61 = vpop.eup %2670  ;;  %2690 = vrcp.f32 %v1494_v59  ;;  %v1575_v62 = vmul.f32 -1.442695, %v2366_v60  ;;  %v1423_v63 = vpop.f32.mrb[61].mxu0 }
 0x886   :  { %v2673_v25 = vpop.eup %2672  ;;  %v1497_v26 = vadd.f32 1.0, %v2671_v61  ;;  %2692 = vpow2.f32 %v1572_v58  ;;  %v1574_v27 = vmul.f32 -1.442695, %v1423_v63 }
 0x887   :  { %v2675_v28 = vpop.eup %2674  ;;  %1539 = vst [vmem:[%s3249_s7 + $0x8] sm:$0xff] %v2673_v25  ;;  %2694 = vpow2.f32 %v1575_v62 }
 0x888   :  { %v2677_v29 = vpop.eup %2676  ;;  %1538 = vst [vmem:[%s3249_s7] sm:$0xff] %v2675_v28  ;;  %2696 = vrcp.f32 %v1497_v26  ;;  %v2369_v30 = vpop.f32.mrb[62].mxu0 }
 0x889   :  { %v2679_v31 = vpop.eup %2678  ;;  %v1496_v32 = vadd.f32 1.0, %v2677_v29  ;;  %2698 = vpow2.f32 %v1574_v27  ;;  %v1577_v33 = vmul.f32 -1.442695, %v2369_v30  ;;  %v1433_v34 = vpop.f32.mrb[63].mxu0 }
 0x88a   :  { %v2681_v35 = vpop.eup %2680  ;;  %v1499_v36 = vadd.f32 1.0, %v2679_v31  ;;  %v1576_v37 = vmul.f32 -1.442695, %v1433_v34 }
 0x88b   :  { %v2683_v38 = vpop.eup %2682  ;;  %1541 = vst [vmem:[%s3249_s7 + $0x18] sm:$0xff] %v2681_v35  ;;  %2700 = vrcp.f32 %v1496_v32 }
 0x88c   :  { %v2685_v39 = vpop.eup %2684  ;;  %1540 = vst [vmem:[%s3249_s7 + $0x10] sm:$0xff] %v2683_v38  ;;  %2702 = vrcp.f32 %v1499_v36 }
 0x88d   :  { %v2687_v0 = vpop.eup %2686  ;;  %v1498_v1 = vadd.f32 1.0, %v2685_v39  ;;  %2704 = vpow2.f32 %v1577_v33 }
 0x88e   :  { %v2689_v2 = vpop.eup %2688  ;;  %v1501_v3 = vadd.f32 1.0, %v2687_v0  ;;  %2706 = vpow2.f32 %v1576_v37 }
 0x88f   :  { %v2691_v4 = vpop.eup %2690  ;;  %1543 = vst [vmem:[%s3249_s7 + $0x28] sm:$0xff] %v2689_v2  ;;  %2708 = vrcp.f32 %v1498_v1 }
 0x890   :  { %v2693_v5 = vpop.eup %2692  ;;  %1542 = vst [vmem:[%s3249_s7 + $0x20] sm:$0xff] %v2691_v4  ;;  %2710 = vrcp.f32 %v1501_v3 }
 0x891   :  { %v2695_v6 = vpop.eup %2694  ;;  %v1500_v7 = vadd.f32 1.0, %v2693_v5 }
 0x892   :  { %v2697_v8 = vpop.eup %2696  ;;  %v1503_v9 = vadd.f32 1.0, %v2695_v6 }
 0x893   :  { %v2699_v10 = vpop.eup %2698  ;;  %1545 = vst [vmem:[%s3249_s7 + $0x38] sm:$0xff] %v2697_v8  ;;  %2712 = vrcp.f32 %v1500_v7 }
 0x894   :  { %2714 = vrcp.f32 %v1503_v9  ;;  %v1502_v11 = vadd.f32 1.0, %v2699_v10 }
 0x895   :  { %v2701_v12 = vpop.eup %2700 }
 0x896   :  { %v2703_v13 = vpop.eup %2702  ;;  %1544 = vst [vmem:[%s3249_s7 + $0x30] sm:$0xff] %v2701_v12  ;;  %2716 = vrcp.f32 %v1502_v11 }
 0x897   :  { %v2705_v14 = vpop.eup %2704  ;;  %1547 = vst [vmem:[%s3249_s7 + $0x48] sm:$0xff] %v2703_v13 }
 0x898   :  { %v2707_v15 = vpop.eup %2706  ;;  %v1505_v16 = vadd.f32 1.0, %v2705_v14 }
 0x899   :  { %v2709_v17 = vpop.eup %2708  ;;  %v1504_v18 = vadd.f32 1.0, %v2707_v15 }
 0x89a   :  { %v2711_v40 = vpop.eup %2710  ;;  %1546 = vst [vmem:[%s3249_s7 + $0x40] sm:$0xff] %v2709_v17  ;;  %2718 = vrcp.f32 %v1505_v16 }
 0x89b   :  { %1549 = vst [vmem:[%s3249_s7 + $0x58] sm:$0xff] %v2711_v40  ;;  %2720 = vrcp.f32 %v1504_v18 }
 0x89d   :  { %v2713_v19 = vpop.eup %2712 }
 0x89e   :  { %v2715_v20 = vpop.eup %2714  ;;  %1548 = vst [vmem:[%s3249_s7 + $0x50] sm:$0xff] %v2713_v19 }
 0x89f   :  { %1551 = vst [vmem:[%s3249_s7 + $0x68] sm:$0xff] %v2715_v20 }
 0x8a0   :  { %v2717_v21 = vpop.eup %2716 }
 0x8a1   :  { %1550 = vst [vmem:[%s3249_s7 + $0x60] sm:$0xff] %v2717_v21 }
 0x8a4   :  { %v2719_v22 = vpop.eup %2718 }
 0x8a5   :  { %v2721_v23 = vpop.eup %2720  ;;  %1553 = vst [vmem:[%s3249_s7 + $0x78] sm:$0xff] %v2719_v22 }
 0x8a6   :  { %1552 = vst [vmem:[%s3249_s7 + $0x70] sm:$0xff] %v2721_v23 }

</bundles_post_ra>
